<compile_context>
chip_gen: v7x
topology: tpu7x:2x2x1
jax: 0.10.0
libtpu: 0.0.40
codegen_flags: <defaults>
</compile_context>

<pallas_src>
import functools

import jax
import jax.numpy as jnp
from jax.experimental import pallas as pl
from jax.experimental.pallas import tpu as pltpu


def _round_up(x, m):
    return (x + m - 1) // m * m


def _activation_fn(name):
    if name == "tanh":
        return jnp.tanh
    if name == "relu":
        return lambda v: jnp.maximum(v, 0.0)
    if name == "sigmoid":
        return jax.nn.sigmoid
    raise ValueError("activation function {} is not supported".format(name))


def mlp_kernel(x_ref, w1_ref, b1_ref, w2_ref, b2_ref, o_ref, *, act):
    # "Batch on lanes" layout:
    #   x_ref  : (n_inputs, batch_tile)   streamed input tile (lane-dense)
    #   w1_ref : (n_hidden, n_inputs)     VMEM-resident (constant block index)
    #   b1_ref : (n_hidden, 1)            VMEM-resident
    #   w2_ref : (n_hidden, 1)            VMEM-resident
    #   b2_ref : (1, 1) in SMEM           scalar bias
    #   o_ref  : (1, batch_tile)          lane-dense output tile
    #
    # First layer: (n_hidden, n_inputs) @ (n_inputs, tile) on the MXU (slot is
    # otherwise idle; EUP / per-step overhead bind), f32 accumulate.
    h = jnp.dot(w1_ref[...], x_ref[...], preferred_element_type=jnp.float32)
    h = act(h + b1_ref[...])                      # VPU bias add + EUP activation
    # Second layer has one output feature: broadcast-multiply on the VPU and
    # reduce over hidden (sublanes) on the XLU instead of a degenerate N=1 MXU op.
    y = jnp.sum(h * w2_ref[...], axis=0, keepdims=True) + b2_ref[0, 0]
    o_ref[...] = y.astype(o_ref.dtype)


def _auto_batch_tile(batch, n_inputs, n_hidden, x_itemsize):
    # Largest lane tile (multiple of 128, capped at 4096) such that:
    #   * the f32 hidden intermediate (n_hidden, tile) stays <= 4 MiB,
    #   * the (double-buffered) streamed x tile stays <= 8 MiB total,
    #   * we never tile past round_up(batch, 128).
    cap_h = max(128, (4 << 20) // (4 * max(n_hidden, 1)))
    cap_x = max(128, (4 << 20) // (x_itemsize * max(n_inputs, 1)))
    tile = min(4096, cap_h, cap_x, _round_up(batch, 128))
    return max(128, tile // 128 * 128)


def nn_regressor_forward(x, w1, b1, w2, b2, *, activation="tanh",
                         batch_tile=None, compute_dtype=None):
    """Forward pass of NNRegressor.

    Parameters use PyTorch nn.Linear conventions:
      x  : (batch, n_inputs)
      w1 : (n_hidden, n_inputs),  b1 : (n_hidden,)
      w2 : (1, n_hidden),         b2 : (1,)
    Returns (batch, 1) in x.dtype.
    compute_dtype: optional dtype (e.g. jnp.bfloat16) for the streamed x / w1
    operands; accumulation, biases and the activation stay in f32.
    """
    batch, n_inputs = x.shape
    n_hidden = w1.shape[0]
    out_dtype = x.dtype
    act = _activation_fn(activation)

    stream_dtype = jnp.dtype(compute_dtype) if compute_dtype is not None else jnp.dtype(x.dtype)
    tile = batch_tile if batch_tile is not None else _auto_batch_tile(
        batch, n_inputs, n_hidden, stream_dtype.itemsize)
    tile = max(128, _round_up(min(tile, _round_up(batch, 128)), 128))
    padded = _round_up(batch, tile)
    grid = (padded // tile,)

    # --- Wrapper-side layout plumbing: pad batch, put it on the lane axis.
    x_p = x if padded == batch else jnp.pad(x, ((0, padded - batch), (0, 0)))
    x_t = x_p.T                                    # (n_inputs, padded)
    w1_c = w1                                      # (n_hidden, n_inputs)
    if compute_dtype is not None:                  # bf16 streaming on v6e/v7x
        x_t = x_t.astype(compute_dtype)
        w1_c = w1_c.astype(compute_dtype)
    b1_c = jnp.asarray(b1, jnp.float32).reshape(n_hidden, 1)
    w2_c = jnp.asarray(w2, jnp.float32).reshape(n_hidden, 1)
    b2_c = jnp.asarray(b2, jnp.float32).reshape(1, 1)

    # --- VMEM budget: raise the scoped limit above the v5e 16 MiB default only
    # when the double-buffered tiles + hidden intermediate need it.
    x_tile_bytes = n_inputs * tile * x_t.dtype.itemsize
    out_tile_bytes = tile * jnp.dtype(out_dtype).itemsize
    h_bytes = n_hidden * tile * 4
    param_bytes = (w1_c.size * w1_c.dtype.itemsize + b1_c.size * 4 + w2_c.size * 4)
    needed = 2 * (x_tile_bytes + out_tile_bytes) + h_bytes + param_bytes + (2 << 20)
    vmem_limit = int(min(needed + (8 << 20), 48 << 20)) if needed > (12 << 20) else None

    # Advisory cost estimate so XLA schedules neighbours sensibly.
    flops = 2 * padded * n_inputs * n_hidden + 2 * padded * n_hidden
    transcendentals = padded * n_hidden if activation in ("tanh", "sigmoid") else 0
    bytes_accessed = (x_t.size * x_t.dtype.itemsize + param_bytes + 4
                      + padded * jnp.dtype(out_dtype).itemsize)
    cost = pl.CostEstimate(flops=flops, transcendentals=transcendentals,
                           bytes_accessed=bytes_accessed)

    out_t = pl.pallas_call(
        functools.partial(mlp_kernel, act=act),
        out_shape=jax.ShapeDtypeStruct((1, padded), out_dtype),
        grid_spec=pltpu.PrefetchScalarGridSpec(
            num_scalar_prefetch=0,
            grid=grid,
            in_specs=[
                # streamed, lane-dense x tile
                pl.BlockSpec((n_inputs, tile), lambda i: (0, i)),
                # parameters: constant block index -> stay VMEM-resident
                pl.BlockSpec((n_hidden, n_inputs), lambda i: (0, 0)),
                pl.BlockSpec((n_hidden, 1), lambda i: (0, 0)),
                pl.BlockSpec((n_hidden, 1), lambda i: (0, 0)),
                # scalar second bias lives in SMEM (no VMEM double-buffer slot)
                pl.BlockSpec(memory_space=pltpu.MemorySpace.SMEM),
            ],
            # lane-dense output tile
            out_specs=pl.BlockSpec((1, tile), lambda i: (0, i)),
        ),
        compiler_params=pltpu.CompilerParams(
            dimension_semantics=("parallel",),   # megacore sharding on v7x
            vmem_limit_bytes=vmem_limit,
        ),
        cost_estimate=cost,
    )(x_t, w1_c, b1_c, w2_c, b2_c)

    # back to PyTorch layout (batch, 1), dropping padding
    return out_t[0, :batch].reshape(batch, 1)


def init_params(key, n_inputs, n_hidden, dtype=jnp.float32):
    # Deterministic synthetic init (PyTorch-Linear-like uniform ranges, PyTorch shapes).
    k1, k2, k3, k4 = jax.random.split(key, 4)
    bound1 = 1.0 / (n_inputs ** 0.5)
    bound2 = 1.0 / (n_hidden ** 0.5)
    w1 = jax.random.uniform(k1, (n_hidden, n_inputs), dtype, -bound1, bound1)
    b1 = jax.random.uniform(k2, (n_hidden,), dtype, -bound1, bound1)
    w2 = jax.random.uniform(k3, (1, n_hidden), dtype, -bound2, bound2)
    b2 = jax.random.uniform(k4, (1,), dtype, -bound2, bound2)
    return w1, b1, w2, b2


if __name__ == "__main__":
    key = jax.random.PRNGKey(0)
    kx, kp, kx2 = jax.random.split(key, 3)

    batch, n_inputs, n_hidden = 16, 4, 32
    x = jax.random.normal(kx, (batch, n_inputs), dtype=jnp.float32)
    w1, b1, w2, b2 = init_params(kp, n_inputs, n_hidden)

    # f32 tanh path
    y = jax.block_until_ready(nn_regressor_forward(x, w1, b1, w2, b2))
    y_ref = jnp.tanh(x @ w1.T + b1) @ w2.T + b2
    assert y.shape == (batch, 1)
    assert jnp.allclose(y, y_ref.reshape(batch, 1), atol=1e-5, rtol=1e-5)

    # relu path (exercises the non-EUP activation)
    y_r = jax.block_until_ready(nn_regressor_forward(x, w1, b1, w2, b2, activation="relu"))
    y_r_ref = jnp.maximum(x @ w1.T + b1, 0.0) @ w2.T + b2
    assert jnp.allclose(y_r, y_r_ref.reshape(batch, 1), atol=1e-5, rtol=1e-5)

    # bf16-operand streaming path: bf16 matmul inputs, f32 accumulate/bias/tanh.
    y_bf = jax.block_until_ready(
        nn_regressor_forward(x, w1, b1, w2, b2, compute_dtype=jnp.bfloat16))
    x_b = x.astype(jnp.bfloat16).astype(jnp.float32)
    w1_b = w1.astype(jnp.bfloat16).astype(jnp.float32)
    y_ref_bf = jnp.tanh(x_b @ w1_b.T + b1) @ w2.T + b2
    assert jnp.allclose(y_bf, y_ref_bf.reshape(batch, 1), atol=1e-4, rtol=1e-4)

    # larger, non-divisible batch: exercises multi-step grid + padding path
    batch2 = 5000
    x2 = jax.random.normal(kx2, (batch2, n_inputs), dtype=jnp.float32)
    y2 = jax.block_until_ready(nn_regressor_forward(x2, w1, b1, w2, b2))
    y2_ref = jnp.tanh(x2 @ w1.T + b1) @ w2.T + b2
    assert y2.shape == (batch2, 1)
    assert jnp.allclose(y2, y2_ref.reshape(batch2, 1), atol=1e-5, rtol=1e-5)

    print("KERNEL_OK")
</pallas_src>

<mosaic_0001>
module attributes {stable_mosaic.version = 11 : i64} {
  func.func @mlp_kernel(%arg0: i32, %arg1: memref<4x128xf32, #tpu.memory_space<vmem>>, %arg2: memref<32x4xf32, #tpu.memory_space<vmem>>, %arg3: memref<32x1xf32, #tpu.memory_space<vmem>>, %arg4: memref<32x1xf32, #tpu.memory_space<vmem>>, %arg5: memref<1x1xf32, #tpu.memory_space<smem>>, %arg6: memref<1x128xf32, #tpu.memory_space<vmem>>) attributes {dimension_semantics = [#tpu.dimension_semantics<parallel>], iteration_bounds = array<i64: 1>, scalar_prefetch = 0 : i64, scratch_operands = 0 : i64, tpu.core_type = #tpu.core_type<tc>, window_params = [{transform_indices = @transform_0, window_bounds = array<i64: 4, 128>}, {pipeline_mode = #tpu.pipeline_mode<synchronous>, transform_indices = @transform_1, window_bounds = array<i64: 32, 4>}, {pipeline_mode = #tpu.pipeline_mode<synchronous>, transform_indices = @transform_2, window_bounds = array<i64: 32, 1>}, {pipeline_mode = #tpu.pipeline_mode<synchronous>, transform_indices = @transform_3, window_bounds = array<i64: 32, 1>}, {transform_indices = @transform_4, window_bounds = array<i64: 1, 1>}, {transform_indices = @transform_5, window_bounds = array<i64: 1, 128>}]} {
    %c0 = arith.constant 0 : index
    %c0_0 = arith.constant 0 : index
    %0 = vector.load %arg2[%c0, %c0_0] : memref<32x4xf32, #tpu.memory_space<vmem>>, vector<32x4xf32>
    %c0_1 = arith.constant 0 : index
    %c0_2 = arith.constant 0 : index
    %1 = vector.load %arg1[%c0_1, %c0_2] : memref<4x128xf32, #tpu.memory_space<vmem>>, vector<4x128xf32>
    %cst = arith.constant dense<0.000000e+00> : vector<32x128xf32>
    %2 = tpu.matmul %0, %1, %cst {dimension_numbers = #tpu.dot_dimension_numbers<[1], [0], [0], [1], [0, 0, 1, 1], [], []>} : vector<32x4xf32>, vector<4x128xf32>, vector<32x128xf32> -> vector<32x128xf32>
    %c0_3 = arith.constant 0 : index
    %c0_4 = arith.constant 0 : index
    %3 = vector.load %arg3[%c0_3, %c0_4] : memref<32x1xf32, #tpu.memory_space<vmem>>, vector<32x1xf32>
    %4 = vector.broadcast %3 : vector<32x1xf32> to vector<32x128xf32>
    %5 = arith.addf %2, %4 : vector<32x128xf32>
    %6 = math.tanh %5 : vector<32x128xf32>
    %c0_5 = arith.constant 0 : index
    %c0_6 = arith.constant 0 : index
    %7 = vector.load %arg4[%c0_5, %c0_6] : memref<32x1xf32, #tpu.memory_space<vmem>>, vector<32x1xf32>
    %8 = vector.broadcast %7 : vector<32x1xf32> to vector<32x128xf32>
    %9 = arith.mulf %6, %8 : vector<32x128xf32>
    %cst_7 = arith.constant dense<0.000000e+00> : vector<128xf32>
    %10 = vector.multi_reduction <add>, %9, %cst_7 [0] : vector<32x128xf32> to vector<128xf32>
    %11 = vector.shape_cast %10 : vector<128xf32> to vector<1x128xf32>
    %c0_8 = arith.constant 0 : index
    %c0_9 = arith.constant 0 : index
    %12 = memref.load %arg5[%c0_8, %c0_9] : memref<1x1xf32, #tpu.memory_space<smem>>
    %13 = vector.broadcast %12 : f32 to vector<1x128xf32>
    %14 = arith.addf %11, %13 : vector<1x128xf32>
    %c0_10 = arith.constant 0 : index
    %c0_11 = arith.constant 0 : index
    %15 = vector.load %arg6[%c0_10, %c0_11] : memref<1x128xf32, #tpu.memory_space<vmem>>, vector<1x128xf32>
    tpu.vector_store %arg6[%c0_10, %c0_11], %14 {strides = array<i32>} : memref<1x128xf32, #tpu.memory_space<vmem>>, vector<1x128xf32>,
    return
  }
  func.func @transform_0(%arg0: i32) -> (i32, i32) {
    %c0_i32 = arith.constant 0 : i32
    %c0_i32_0 = arith.constant 0 : i32
    return %c0_i32, %arg0 : i32, i32
  }
  func.func @transform_1(%arg0: i32) -> (i32, i32) {
    %c0_i32 = arith.constant 0 : i32
    %c0_i32_0 = arith.constant 0 : i32
    %c0_i32_1 = arith.constant 0 : i32
    return %c0_i32, %c0_i32_0 : i32, i32
  }
  func.func @transform_2(%arg0: i32) -> (i32, i32) {
    %c0_i32 = arith.constant 0 : i32
    %c0_i32_0 = arith.constant 0 : i32
    %c0_i32_1 = arith.constant 0 : i32
    return %c0_i32, %c0_i32_0 : i32, i32
  }
  func.func @transform_3(%arg0: i32) -> (i32, i32) {
    %c0_i32 = arith.constant 0 : i32
    %c0_i32_0 = arith.constant 0 : i32
    %c0_i32_1 = arith.constant 0 : i32
    return %c0_i32, %c0_i32_0 : i32, i32
  }
  func.func @transform_4(%arg0: i32) -> (i32, i32) {
    %c0_i32 = arith.constant 0 : i32
    %c0_i32_0 = arith.constant 0 : i32
    %c0_i32_1 = arith.constant 0 : i32
    return %c0_i32, %c0_i32_0 : i32, i32
  }
  func.func @transform_5(%arg0: i32) -> (i32, i32) {
    %c0_i32 = arith.constant 0 : i32
    %c0_i32_0 = arith.constant 0 : i32
    return %c0_i32, %arg0 : i32, i32
  }
}

</mosaic_0001>

<bundles_post_ra>
// kernel: tpu_custom_call.1
= control target key start
LH: loop header
LB: loop body
LE: loop exit
PB: predicated region body
PF: predicated region fallthrough
CT: control target
= control target key end

     0   :  { %vm64_vm0 = vcmask 1043456   ;;  %vm51_vm1 = vcmask 31744   ;;  %s354_s0 = inlined_call_operand.vmem [shape: f32[4,128], index: 0, kind: input, shape index: {}]   ;;  %s355_s1 = inlined_call_operand.vmem [shape: f32[32,4], index: 1, kind: input, shape index: {}]   ;;  %s356_s2 = inlined_call_operand.vmem [shape: f32[32,1], index: 2, kind: input, shape index: {}]   ;;  %s357_s3 = inlined_call_operand.vmem [shape: f32[32,1], index: 3, kind: input, shape index: {}]   ;;  %s358_s4 = inlined_call_operand.<no memory space> [shape: f32[1,1], index: 4, kind: input, shape index: {}]   ;;  %s359_s5 = inlined_call_operand.hbm [shape: f32[1,128], index: 5, kind: output, shape index: {}]  }
   0x1   :  { %v26_v0 = vld [vmem:[%s354_s0] sm:$0xf]  ;;  %v24_v2 = vld [vmem:[%s355_s1 + $0x10] sm:$0xff]  ;;  %v23_v3 = vld [vmem:[%s355_s1 + $0x8] sm:$0xff] }
   0x2   :  { %v22_v1 = vld [vmem:[%s355_s1] sm:$0xff]  ;;  %222 = vmatprep.subr.msk.mxu0 %vm64_vm0, %v26_v0  ;;  %230 = vmatprep.subr.msk.mxu1 %vm64_vm0, %v26_v0  ;;  %v25_v4 = vld [vmem:[%s355_s1 + $0x18] sm:$0xff]  ;;  %v29_v6 = vld [vmem:[%s356_s2 + $0x10] sm:$0xff] }
   0x3   :  { %223 = vmatpush3.msk.msra.mxu0 %vm64_vm0, %v26_v0  ;;  %231 = vmatpush3.msk.msra.mxu1 %vm64_vm0, %v26_v0  ;;  %v27_v5 = vld [vmem:[%s356_s2] sm:$0xff] }
   0x4   :  { %224 = vmatprep.mubr.msk.f32.mxu0 %vm51_vm1, %v22_v1  ;;  %227 = vmatprep.mubr.msk.f32.mxu1 %vm51_vm1, %v24_v2 }
   0x5   :  { %225 = vmatmul.mubr.msk.f32.vlgmr.msra.gmra.mrb[0].mxu0 %vm51_vm1, %v23_v3  ;;  %228 = vmatmul.mubr.msk.f32.vlgmr.msra.gmra.mrb[0].mxu1 %vm51_vm1, %v25_v4 }
   0x6   :  { %11 = vsyncpa [#allocation4], 0  ;;  %v268_v7 = vmov 0   ;;  %v28_v8 = vld [vmem:[%s356_s2 + $0x8] sm:$0xff]  ;;  %v30_v9 = vld [vmem:[%s356_s2 + $0x18] sm:$0xff]  ;;  %v195_v46 = vstv %s358_s4  ;;  %s269_s17 = smov [#allocation3]  }
   0x7   :  { %234 = vset.pattern.permute.xlu0 %v268_v7  ;;  %235 = vset.pattern.permute.xlu1 %v268_v7  ;;  %v157_v10 = vld [vmem:[%s357_s3] sm:$0xff]  ;;  %v158_v11 = vld [vmem:[%s357_s3 + $0x8] sm:$0xff]  ;;  %v159_v12 = vld [vmem:[%s357_s3 + $0x10] sm:$0xff]  ;;  %s204_s18 = sshll.u32 %s269_s17, 4  ;;  %s205_s18 = int_to_ptr.vmem [resolvable:$true] %s204_s18 }
   0x8   :  { %33 = vperm.xlu0 %234, %v27_v5   ;;  %43 = vperm.xlu1 %235, %v29_v6   ;;  %v160_v13 = vld [vmem:[%s357_s3 + $0x18] sm:$0xff]  ;;  %s244_s19 = scalar_lea.vmem %s205_s18, 16  ;;  %s248_s20 = scalar_lea.vmem %s205_s18, 32 }
   0x9   :  { %p245_p0 = scmp.ne.s32.totalorder %s205_s18, %s244_s19  ;;  %p249_p1 = scmp.lt.s32.totalorder %s205_s18, %s205_s18 }
   0xa   :  { %p250_p2 = scmp.lt.s32.totalorder %s248_s20, %s244_s19 }
   0xc   :  { %38 = vperm.xlu0 %234, %v28_v8   ;;  %48 = vperm.xlu1 %235, %v30_v9   ;;  %p251_p3 = por %p250_p2, %p249_p1 }
   0xe   :  { %p252_p4 = pnand %p251_p3, %p245_p0 }
  0x10   :  { %163 = vperm.xlu0 %234, %v157_v10   ;;  %168 = vperm.xlu1 %235, %v158_v11  }
  0x14   :  { %173 = vperm.xlu0 %234, %v159_v12   ;;  %178 = vperm.xlu1 %235, %v160_v13  }
  0x87   :  { %v34_v14 = vpop.permute.xlu0 %33  ;;  %v44_v15 = vpop.permute.xlu1 %43 }
  0x8b   :  { %v39_v16 = vpop.permute.xlu0 %38  ;;  %v49_v22 = vpop.permute.xlu1 %48 }
  0x8f   :  { %v164_v26 = vpop.permute.xlu0 %163  ;;  %v169_v28 = vpop.permute.xlu1 %168 }
  0x93   :  { %v174_v34 = vpop.permute.xlu0 %173  ;;  %v179_v37 = vpop.permute.xlu1 %178 }
  0xd8   :  { %v226_v17 = vpop.f32.mrb[0].mxu0  ;;  %v229_v18 = vpop.f32.mrb[0].mxu1 }
  0xd9   :  { %v140_v19 = vadd.f32 %v226_v17, %v39_v16  ;;  %v134_v20 = vpop.f32.mrb[1].mxu0  ;;  %v144_v21 = vpop.f32.mrb[1].mxu1  ;;  %v150_v25 = vadd.f32 %v229_v18, %v49_v22 }
  0xda   :  { %v135_v23 = vadd.f32 %v134_v20, %v34_v14  ;;  %v145_v24 = vadd.f32 %v144_v21, %v44_v15 }
  0xdb   :  { %236 = vtanh.f32 %v140_v19 }
  0xdc   :  { %238 = vtanh.f32 %v135_v23 }
  0xdd   :  { %240 = vtanh.f32 %v145_v24 }
  0xde   :  { %242 = vtanh.f32 %v150_v25 }
  0xe5   :  { %v237_v27 = vpop.eup %236 }
  0xe6   :  { %v182_v29 = vmul.f32 %v237_v27, %v169_v28  ;;  %v239_v30 = vpop.eup %238 }
  0xe7   :  { %v241_v31 = vpop.eup %240  ;;  %v181_v32 = vmul.f32 %v239_v30, %v164_v26 }
  0xe8   :  { %v243_v33 = vpop.eup %242  ;;  %v183_v36 = vmul.f32 %v241_v31, %v174_v34 }
  0xe9   :  { %v185_v35 = vadd.f32 %v182_v29, %v181_v32  ;;  %v184_v38 = vmul.f32 %v243_v33, %v179_v37 }
  0xeb   :  { %v186_v39 = vadd.f32 %v185_v35, %v183_v36 }
  0xed   :  { %v187_v40 = vadd.f32 %v186_v39, %v184_v38 }
  0xef   :  { %v188_v41 = vrot.slane %v187_v40, 4 }
  0xf1   :  { %v189_v42 = vadd.f32 %v188_v41, %v187_v40 }
  0xf3   :  { %v190_v43 = vrot.slane %v189_v42, 2 }
  0xf5   :  { %v191_v44 = vadd.f32 %v190_v43, %v189_v42 }
  0xf7   :  { %v192_v45 = vrot.slane %v191_v44, 1 }
  0xf9   :  { %v193_v47 = vadd.f32 %v192_v45, %v191_v44 }
  0xfb   :  { %v196_v48 = vadd.f32 %v195_v46, %v193_v47 }
  0xfd   :  { %197 = vst [vmem:[#allocation3] sm:$0x1] %v196_v48 }
  0xfe   :  { %255 = shalt.err (!%p252_p4)
}
  0xff   :  { %s256_s23 = scalar_lea.hbm %s359_s5, 16 }
 0x100   :  { %p257_p5 = scmp.ne.s32.totalorder %s359_s5, %s256_s23  ;;  %p260_p6 = scmp.lt.u32.totalorder %s256_s23, %s359_s5 }
 0x102   :  { %p262_p7 = pnand %p260_p6, %p257_p5 }
 0x104   :  { %265 = shalt.err (!%p262_p7)
}
 0x105   :  { %207 = dma.vmem_to_hbm [thread:$0]  %s205_s18, 16, %s359_s5, [#allocation4]  }
 0x106   :  { %266 = dma.done.wait [#allocation4], 16  }
 0x107   :  { %267 = vsyncadd [#allocation4], 4294967280 }
 0x108   :  { %211 = vsyncpa [#allocation4], 1 }

</bundles_post_ra>
